<compile_context>
chip_gen: v6e
topology: v6e:2x2x1
jax: 0.10.0
libtpu: 0.0.40
codegen_flags: <defaults>
</compile_context>

<pallas_src>
import functools
import math

import jax
import jax.numpy as jnp
from jax.experimental import pallas as pl
from jax.experimental.pallas import tpu as pltpu

_SQRT_2_OVER_PI = 0.7978845608028654


def _gelu_tanh(x):
    # TODO(synk): nn.GELU() default is the exact erf formulation; we use the
    # tanh approximation (tanh lowers to the EUP on every TPU generation;
    # erf lowering in Mosaic is not guaranteed). Elementwise diff < ~3e-3.
    return 0.5 * x * (1.0 + jnp.tanh(_SQRT_2_OVER_PI * (x + 0.044715 * (x * x * x))))


def _mlp_kernel(x_ref, w1_ref, b1_ref, w2_ref, b2_ref, o_ref, acc_ref,
                *, gelu_dtype):
    """One (row-tile, hidden-chunk) step of the fused MLP."""
    k = pl.program_id(1)

    @pl.when(k == 0)
    def _():
        acc_ref[...] = jnp.zeros_like(acc_ref)

    # fc1 chunk: (tm, d_in) @ (d_in, tk) -> f32 accumulate on the MXU.
    h = jnp.dot(x_ref[...], w1_ref[...], preferred_element_type=jnp.float32)
    h = h + b1_ref[...].astype(jnp.float32)
    # GELU (+ drop1 p=0.0 identity). bf16 math on v6e/v7x, f32 on v5e.
    h = _gelu_tanh(h.astype(gelu_dtype))
    # fc2 partial product for this hidden chunk, accumulated in f32 scratch.
    acc_ref[...] += jnp.dot(h.astype(w2_ref.dtype), w2_ref[...],
                            preferred_element_type=jnp.float32)

    @pl.when(k == pl.num_programs(1) - 1)
    def _():
        # (+ drop2 p=0.0 identity.) Ragged last row block is masked on store.
        o_ref[...] = (acc_ref[...] + b2_ref[...].astype(jnp.float32)
                      ).astype(o_ref.dtype)


def _round_up(x, m):
    return ((x + m - 1) // m) * m


def _pad_to(a, axis, target):
    pad = target - a.shape[axis]
    if pad == 0:
        return a
    widths = [(0, 0)] * a.ndim
    widths[axis] = (0, pad)
    return jnp.pad(a, widths)


def mlp_forward(x, w1, b1, w2, b2, *, row_tile=None, hidden_tile=512,
                compute_dtype=jnp.bfloat16):
    """x: (..., D_in); w1: (D_in, H); b1: (H,); w2: (H, D_out); b2: (D_out,)."""
    orig_shape = x.shape
    out_dtype = x.dtype
    d_in = orig_shape[-1]
    d_hidden = w1.shape[1]
    d_out = w2.shape[1]

    # Per-generation knobs.
    kind = jax.devices()[0].device_kind.lower()
    is_v7 = "v7" in kind
    is_v5_or_older = ("v5" in kind) or ("v4" in kind) or ("v3" in kind)
    if row_tile is None:
        row_tile = 256 if is_v7 else 512
    # v5e VPU/EUP have no bf16: keep GELU math in f32 there.
    gelu_dtype = (jnp.float32 if (is_v5_or_older or compute_dtype == jnp.float32)
                  else jnp.bfloat16)
    # Explicit VMEM budget (scoped defaults 16/32 MiB are too small):
    # generous on v5e/v6e (128 MiB physical), conservative on v7x (64 MiB).
    vmem_limit = (48 << 20) if is_v7 else (100 << 20)

    # Flatten leading dims to rows; rows are independent.
    x2d = x.reshape(-1, d_in)
    rows = x2d.shape[0]

    # Lane-dense padding of the feature dims to multiples of 128 (zero rows /
    # columns contribute nothing). Real ViT dims are already multiples of 128.
    d_in_p = _round_up(d_in, 128)
    d_out_p = _round_up(d_out, 128)
    h_p = _round_up(d_hidden, 128)

    # Hidden chunk: a multiple of 128 that evenly divides the padded hidden
    # dim (so the reduction axis has no ragged block).
    tk = h_p
    if h_p > hidden_tile:
        tk = 128
        for cand in range(128, hidden_tile + 1, 128):
            if h_p % cand == 0:
                tk = cand

    # bf16 MXU inputs; biases and accumulation stay f32.
    x2d = _pad_to(x2d, 1, d_in_p).astype(compute_dtype)
    w1_p = _pad_to(_pad_to(w1, 0, d_in_p), 1, h_p).astype(compute_dtype)
    b1_p = _pad_to(b1.reshape(1, -1), 1, h_p).astype(jnp.float32)
    w2_p = _pad_to(_pad_to(w2, 0, h_p), 1, d_out_p).astype(compute_dtype)
    b2_p = _pad_to(b2.reshape(1, -1), 1, d_out_p).astype(jnp.float32)

    # Sublane-legal row tile (16 for bf16, 8 for f32); no row padding — Pallas
    # masks the ragged last row block. Prefer >=2 row steps so v7x's second
    # TensorCore gets work on the 'parallel' row axis.
    sub = 16 if x2d.dtype == jnp.bfloat16 else 8
    tm = min(row_tile, _round_up(rows, sub))
    if rows > sub:
        tm = min(tm, max(sub, _round_up(pl.cdiv(rows, 2), sub)))
    tm = _round_up(tm, sub)
    grid = (pl.cdiv(rows, tm), h_p // tk)

    flops = 2 * rows * d_in_p * h_p + 2 * rows * h_p * d_out_p
    bytes_accessed = int(
        x2d.size * x2d.dtype.itemsize
        + w1_p.size * w1_p.dtype.itemsize + b1_p.size * 4
        + w2_p.size * w2_p.dtype.itemsize + b2_p.size * 4
        + rows * d_out_p * jnp.dtype(out_dtype).itemsize)
    cost = pl.CostEstimate(flops=flops, transcendentals=rows * h_p,
                           bytes_accessed=bytes_accessed)

    kernel = functools.partial(_mlp_kernel, gelu_dtype=gelu_dtype)

    out = pl.pallas_call(
        kernel,
        out_shape=jax.ShapeDtypeStruct((rows, d_out_p), out_dtype),
        grid_spec=pltpu.PrefetchScalarGridSpec(
            num_scalar_prefetch=0,
            grid=grid,
            in_specs=[
                # x row tile: constant across the hidden axis -> fetched once
                # per row step.
                pl.BlockSpec((tm, d_in_p), lambda i, k: (i, 0)),
                # Weight / bias chunks marching over the hidden dim.
                pl.BlockSpec((d_in_p, tk), lambda i, k: (0, k)),
                pl.BlockSpec((1, tk), lambda i, k: (0, k)),
                pl.BlockSpec((tk, d_out_p), lambda i, k: (k, 0)),
                pl.BlockSpec((1, d_out_p), lambda i, k: (0, 0)),
            ],
            out_specs=pl.BlockSpec((tm, d_out_p), lambda i, k: (i, 0)),
            scratch_shapes=[pltpu.VMEM((tm, d_out_p), jnp.float32)],
        ),
        compiler_params=pltpu.CompilerParams(
            dimension_semantics=("parallel", "arbitrary"),
            vmem_limit_bytes=vmem_limit,
        ),
        cost_estimate=cost,
    )(x2d, w1_p, b1_p, w2_p, b2_p)

    return out[:, :d_out].reshape(*orig_shape[:-1], d_out)


if __name__ == "__main__":
    # Module config: in_features=32, hidden_features=128 (4x, ViT-style),
    # out_features=32; input (batch=2, seq=8, in_features=32).
    in_features, hidden_features, out_features = 32, 128, 32
    B, N = 2, 8

    key = jax.random.PRNGKey(0)
    kx, kw1, kb1, kw2, kb2 = jax.random.split(key, 5)
    x = jax.random.normal(kx, (B, N, in_features), dtype=jnp.float32)

    # PyTorch nn.Linear default init: U(-1/sqrt(fan_in), 1/sqrt(fan_in)).
    lim1 = 1.0 / math.sqrt(in_features)
    w1 = jax.random.uniform(kw1, (in_features, hidden_features), jnp.float32, -lim1, lim1)
    b1 = jax.random.uniform(kb1, (hidden_features,), jnp.float32, -lim1, lim1)
    lim2 = 1.0 / math.sqrt(hidden_features)
    w2 = jax.random.uniform(kw2, (hidden_features, out_features), jnp.float32, -lim2, lim2)
    b2 = jax.random.uniform(kb2, (out_features,), jnp.float32, -lim2, lim2)

    y = mlp_forward(x, w1, b1, w2, b2)
    jax.block_until_ready(y)

    # Pure-JAX mixed-precision reference matching the kernel's compute dtypes
    # (bf16 MXU inputs, f32 accumulation / bias add, tanh-GELU).
    xb, w1b, w2b = (a.astype(jnp.bfloat16) for a in (x, w1, w2))
    h_ref = jnp.dot(xb, w1b, preferred_element_type=jnp.float32) + b1
    h_ref = _gelu_tanh(h_ref)
    y_ref = (jnp.dot(h_ref.astype(jnp.bfloat16), w2b,
                     preferred_element_type=jnp.float32) + b2).astype(x.dtype)

    assert y.shape == y_ref.shape
    # Tolerance covers bf16 GELU math (v6e/v7x) vs the f32-GELU reference.
    assert jnp.allclose(y, y_ref, atol=2e-2, rtol=2e-2), "mismatch vs reference"

    print("KERNEL_OK")
</pallas_src>

<mosaic_0001>
module attributes {stable_mosaic.version = 11 : i64} {
  func.func @_mlp_kernel(%arg0: i32, %arg1: i32, %arg2: memref<16x128xbf16, #tpu.memory_space<vmem>>, %arg3: memref<128x128xbf16, #tpu.memory_space<vmem>>, %arg4: memref<1x128xf32, #tpu.memory_space<vmem>>, %arg5: memref<128x128xbf16, #tpu.memory_space<vmem>>, %arg6: memref<1x128xf32, #tpu.memory_space<vmem>>, %arg7: memref<16x128xf32, #tpu.memory_space<vmem>>, %arg8: memref<16x128xf32, #tpu.memory_space<vmem>>) attributes {dimension_semantics = [#tpu.dimension_semantics<parallel>, #tpu.dimension_semantics<arbitrary>], iteration_bounds = array<i64: 1, 1>, scalar_prefetch = 0 : i64, scratch_operands = 1 : i64, tpu.core_type = #tpu.core_type<tc>, window_params = [{transform_indices = @transform_0, window_bounds = array<i64: 16, 128>}, {transform_indices = @transform_1, window_bounds = array<i64: 128, 128>}, {transform_indices = @transform_2, window_bounds = array<i64: 1, 128>}, {transform_indices = @transform_3, window_bounds = array<i64: 128, 128>}, {pipeline_mode = #tpu.pipeline_mode<synchronous>, transform_indices = @transform_4, window_bounds = array<i64: 1, 128>}, {transform_indices = @transform_5, window_bounds = array<i64: 16, 128>}]} {
    %c0_i32 = arith.constant 0 : i32
    %0 = arith.cmpi eq, %arg1, %c0_i32 : i32
    %1 = arith.extui %0 : i1 to i32
    %c0_i32_0 = arith.constant 0 : i32
    %2 = arith.cmpi ne, %1, %c0_i32_0 : i32
    scf.if %2 {
      %cst_19 = arith.constant 0.000000e+00 : f32
      %31 = vector.broadcast %cst_19 : f32 to vector<16x128xf32>
      %c0_20 = arith.constant 0 : index
      %c0_21 = arith.constant 0 : index
      %32 = vector.load %arg8[%c0_20, %c0_21] : memref<16x128xf32, #tpu.memory_space<vmem>>, vector<16x128xf32>
      tpu.vector_store %arg8[%c0_20, %c0_21], %31 {strides = array<i32>} : memref<16x128xf32, #tpu.memory_space<vmem>>, vector<16x128xf32>,
    } else {
    }
    %c0 = arith.constant 0 : index
    %c0_1 = arith.constant 0 : index
    %3 = vector.load %arg2[%c0, %c0_1] : memref<16x128xbf16, #tpu.memory_space<vmem>>, vector<16x128xbf16>
    %c0_2 = arith.constant 0 : index
    %c0_3 = arith.constant 0 : index
    %4 = vector.load %arg3[%c0_2, %c0_3] : memref<128x128xbf16, #tpu.memory_space<vmem>>, vector<128x128xbf16>
    %cst = arith.constant dense<0.000000e+00> : vector<16x128xf32>
    %5 = tpu.matmul %3, %4, %cst {dimension_numbers = #tpu.dot_dimension_numbers<[1], [0], [0], [1], [0, 0, 1, 1], [], []>} : vector<16x128xbf16>, vector<128x128xbf16>, vector<16x128xf32> -> vector<16x128xf32>
    %c0_4 = arith.constant 0 : index
    %c0_5 = arith.constant 0 : index
    %6 = vector.load %arg4[%c0_4, %c0_5] : memref<1x128xf32, #tpu.memory_space<vmem>>, vector<1x128xf32>
    %7 = vector.broadcast %6 : vector<1x128xf32> to vector<16x128xf32>
    %8 = arith.addf %5, %7 : vector<16x128xf32>
    %9 = arith.truncf %8 : vector<16x128xf32> to vector<16x128xbf16>
    %cst_6 = arith.constant 5.000000e-01 : bf16
    %10 = vector.broadcast %cst_6 : bf16 to vector<16x128xbf16>
    %11 = arith.mulf %10, %9 : vector<16x128xbf16>
    %12 = arith.mulf %9, %9 : vector<16x128xbf16>
    %13 = arith.mulf %12, %9 : vector<16x128xbf16>
    %cst_7 = arith.constant 4.467770e-02 : bf16
    %14 = vector.broadcast %cst_7 : bf16 to vector<16x128xbf16>
    %15 = arith.mulf %14, %13 : vector<16x128xbf16>
    %16 = arith.addf %9, %15 : vector<16x128xbf16>
    %cst_8 = arith.constant 7.968750e-01 : bf16
    %17 = vector.broadcast %cst_8 : bf16 to vector<16x128xbf16>
    %18 = arith.mulf %17, %16 : vector<16x128xbf16>
    %19 = math.tanh %18 : vector<16x128xbf16>
    %cst_9 = arith.constant 1.000000e+00 : bf16
    %20 = vector.broadcast %cst_9 : bf16 to vector<16x128xbf16>
    %21 = arith.addf %20, %19 : vector<16x128xbf16>
    %22 = arith.mulf %11, %21 : vector<16x128xbf16>
    %c0_10 = arith.constant 0 : index
    %c0_11 = arith.constant 0 : index
    %23 = vector.load %arg8[%c0_10, %c0_11] : memref<16x128xf32, #tpu.memory_space<vmem>>, vector<16x128xf32>
    %c0_12 = arith.constant 0 : index
    %c0_13 = arith.constant 0 : index
    %24 = vector.load %arg5[%c0_12, %c0_13] : memref<128x128xbf16, #tpu.memory_space<vmem>>, vector<128x128xbf16>
    %cst_14 = arith.constant dense<0.000000e+00> : vector<16x128xf32>
    %25 = tpu.matmul %22, %24, %cst_14 {dimension_numbers = #tpu.dot_dimension_numbers<[1], [0], [0], [1], [0, 0, 1, 1], [], []>} : vector<16x128xbf16>, vector<128x128xbf16>, vector<16x128xf32> -> vector<16x128xf32>
    %26 = arith.addf %23, %25 : vector<16x128xf32>
    %c0_15 = arith.constant 0 : index
    %c0_16 = arith.constant 0 : index
    %27 = vector.load %arg8[%c0_15, %c0_16] : memref<16x128xf32, #tpu.memory_space<vmem>>, vector<16x128xf32>
    tpu.vector_store %arg8[%c0_15, %c0_16], %26 {strides = array<i32>} : memref<16x128xf32, #tpu.memory_space<vmem>>, vector<16x128xf32>,
    %c0_i32_17 = arith.constant 0 : i32
    %28 = arith.cmpi eq, %arg1, %c0_i32_17 : i32
    %29 = arith.extui %28 : i1 to i32
    %c0_i32_18 = arith.constant 0 : i32
    %30 = arith.cmpi ne, %29, %c0_i32_18 : i32
    scf.if %30 {
      %c0_19 = arith.constant 0 : index
      %c0_20 = arith.constant 0 : index
      %31 = vector.load %arg8[%c0_19, %c0_20] : memref<16x128xf32, #tpu.memory_space<vmem>>, vector<16x128xf32>
      %c0_21 = arith.constant 0 : index
      %c0_22 = arith.constant 0 : index
      %32 = vector.load %arg6[%c0_21, %c0_22] : memref<1x128xf32, #tpu.memory_space<vmem>>, vector<1x128xf32>
      %33 = vector.broadcast %32 : vector<1x128xf32> to vector<16x128xf32>
      %34 = arith.addf %31, %33 : vector<16x128xf32>
      %c0_23 = arith.constant 0 : index
      %c0_24 = arith.constant 0 : index
      %35 = vector.load %arg7[%c0_23, %c0_24] : memref<16x128xf32, #tpu.memory_space<vmem>>, vector<16x128xf32>
      tpu.vector_store %arg7[%c0_23, %c0_24], %34 {strides = array<i32>} : memref<16x128xf32, #tpu.memory_space<vmem>>, vector<16x128xf32>,
    } else {
    }
    return
  }
  func.func @transform_0(%arg0: i32, %arg1: i32) -> (i32, i32) {
    %c0_i32 = arith.constant 0 : i32
    %c0_i32_0 = arith.constant 0 : i32
    return %arg0, %c0_i32 : i32, i32
  }
  func.func @transform_1(%arg0: i32, %arg1: i32) -> (i32, i32) {
    %c0_i32 = arith.constant 0 : i32
    %c0_i32_0 = arith.constant 0 : i32
    return %c0_i32, %arg1 : i32, i32
  }
  func.func @transform_2(%arg0: i32, %arg1: i32) -> (i32, i32) {
    %c0_i32 = arith.constant 0 : i32
    %c0_i32_0 = arith.constant 0 : i32
    return %c0_i32, %arg1 : i32, i32
  }
  func.func @transform_3(%arg0: i32, %arg1: i32) -> (i32, i32) {
    %c0_i32 = arith.constant 0 : i32
    %c0_i32_0 = arith.constant 0 : i32
    return %arg1, %c0_i32 : i32, i32
  }
  func.func @transform_4(%arg0: i32, %arg1: i32) -> (i32, i32) {
    %c0_i32 = arith.constant 0 : i32
    %c0_i32_0 = arith.constant 0 : i32
    %c0_i32_1 = arith.constant 0 : i32
    return %c0_i32, %c0_i32_0 : i32, i32
  }
  func.func @transform_5(%arg0: i32, %arg1: i32) -> (i32, i32) {
    %c0_i32 = arith.constant 0 : i32
    %c0_i32_0 = arith.constant 0 : i32
    return %arg0, %c0_i32 : i32, i32
  }
}

</mosaic_0001>

<bundles_post_ra>
// kernel: tpu_custom_call.1
= control target key start
LH: loop header
LB: loop body
LE: loop exit
PB: predicated region body
PF: predicated region fallthrough
CT: control target
= control target key end

     0   :  { %10 = vsyncpa [#allocation4], 0  ;;  %s598_s0 = inlined_call_operand.hbm [shape: bf16[16,128], index: 0, kind: input, shape index: {}]   ;;  %s599_s1 = inlined_call_operand.hbm [shape: bf16[128,128], index: 1, kind: input, shape index: {}]   ;;  %s600_s2 = inlined_call_operand.vmem [shape: f32[1,128], index: 2, kind: input, shape index: {}]   ;;  %s601_s3 = inlined_call_operand.hbm [shape: bf16[128,128], index: 3, kind: input, shape index: {}]   ;;  %s602_s4 = inlined_call_operand.vmem [shape: f32[1,128], index: 4, kind: input, shape index: {}]   ;;  %s603_s5 = inlined_call_operand.hbm [shape: f32[16,128], index: 5, kind: output, shape index: {}]  }
   0x1   :  { %11 = vsyncpa [#allocation7], 0 }
   0x2   :  { %12 = vsyncpa [#allocation5], 0  ;;  %s540_s18 = smov [#allocation6]   ;;  %s541_s20 = smov [#allocation3]  }
   0x3   :  { %s30_s19 = sshll.u32 %s540_s18, 4  ;;  %s18_s21 = sshll.u32 %s541_s20, 4  ;;  %s31_s19 = int_to_ptr.vmem [resolvable:$true] %s30_s19  ;;  %s19_s21 = int_to_ptr.vmem [resolvable:$true] %s18_s21 }
   0x4   :  { %s462_s22 = scalar_lea.vmem %s31_s19, 1024  ;;  %p467_p1 = scmp.lt.s32.totalorder %s31_s19, %s31_s19 }
   0x5   :  { %p463_p0 = scmp.ne.s32.totalorder %s31_s19, %s462_s22  ;;  %p468_p2 = scmp.lt.s32.totalorder %s462_s22, %s462_s22 }
   0x7   :  { %p469_p3 = por %p468_p2, %p467_p1 }
   0x9   :  { %p470_p4 = pnand %p469_p3, %p463_p0 }
   0xb   :  { %473 = shalt.err (!%p470_p4)
}
   0xc   :  { %s542_s23 = smov 64   ;;  %s543_s24 = smov 4  }
   0xd   :  { %36 = dma.hbm_to_vmem [thread:$0]  %s599_s1, 1024, %s31_s19, [#allocation7], %s542_s23, %s542_s23, %s543_s24  }
   0xe   :  { %s482_s27 = scalar_lea.vmem %s19_s21, 128  ;;  %p487_p6 = scmp.lt.s32.totalorder %s19_s21, %s19_s21 }
   0xf   :  { %p483_p5 = scmp.ne.s32.totalorder %s19_s21, %s482_s27  ;;  %p488_p7 = scmp.lt.s32.totalorder %s482_s27, %s482_s27 }
  0x11   :  { %p489_p8 = por %p488_p7, %p487_p6 }
  0x13   :  { %p490_p9 = pnand %p489_p8, %p483_p5 }
  0x15   :  { %493 = shalt.err (!%p490_p9)
}
  0x16   :  { %24 = dma.hbm_to_vmem [thread:$0]  %s598_s0, 128, %s19_s21, [#allocation4], %s542_s23, %s542_s23, %s543_s24  }
  0x17   :  { %s544_s30 = smov [#allocation8]  }
  0x18   :  { %s44_s6 = sshll.u32 %s544_s30, 4  ;;  %s45_s6 = int_to_ptr.vmem [resolvable:$true] %s44_s6 }
  0x19   :  { %s502_s7 = scalar_lea.vmem %s45_s6, 1024  ;;  %p507_p11 = scmp.lt.s32.totalorder %s45_s6, %s45_s6 }
  0x1a   :  { %p503_p10 = scmp.ne.s32.totalorder %s45_s6, %s502_s7  ;;  %p508_p12 = scmp.lt.s32.totalorder %s502_s7, %s502_s7 }
  0x1c   :  { %p509_p13 = por %p508_p12, %p507_p11 }
  0x1e   :  { %p510_p0 = pnand %p509_p13, %p503_p10 }
  0x20   :  { %513 = shalt.err (!%p510_p0)
}
  0x21   :  { %50 = dma.hbm_to_vmem [thread:$0]  %s601_s3, 1024, %s45_s6, [#allocation7], %s542_s23, %s542_s23, %s543_s24  }
  0x22   :  { %534 = dma.done.wait [#allocation4], 128  }
  0x23   :  { %535 = vsyncadd [#allocation4], 4294967168 }
  0x24   :  { %536 = dma.done.wait [#allocation7], 2048  }
  0x25   :  { %537 = vsyncadd [#allocation7], 4294965248  ;;  %v545_v0 = vmov 0.0   ;;  %vm546_vm0 = vmmov 0   ;;  %v435_v1 = vld [vmem:[#allocation6 + $0x38] sm:$0xff]   ;;  %v436_v2 = vld [vmem:[#allocation6 + $0x30] sm:$0xff]  }
  0x26   :  { %385 = vmatprep.subr.bf16.mxu0 %v545_v0  ;;  %401 = vmatprep.mubr.msk.bf16.mxu0 %vm546_vm0, %v545_v0  ;;  %v437_v3 = vld [vmem:[#allocation6 + $0x28] sm:$0xff]   ;;  %v438_v4 = vld [vmem:[#allocation6 + $0x20] sm:$0xff]   ;;  %v439_v5 = vld [vmem:[#allocation6 + $0x18] sm:$0xff]  }
  0x27   :  { %405 = vmatprep.subr.bf16.mxu1 %v545_v0  ;;  %421 = vmatprep.mubr.msk.bf16.mxu1 %vm546_vm0, %v545_v0  ;;  %v440_v6 = vld [vmem:[#allocation6 + $0x10] sm:$0xff]   ;;  %v441_v7 = vld [vmem:[#allocation6 + $0x8] sm:$0xff]   ;;  %v442_v8 = vld [vmem:[#allocation6] sm:$0xff]  }
  0x28   :  { %386 = vmatpush3.bf16.msra.mxu0 %v435_v1  ;;  %v443_v9 = vld [vmem:[#allocation3] sm:$0xff]   ;;  %v445_v11 = vld [vmem:[#allocation8 + $0x30] sm:$0xff]   ;;  %v446_v12 = vld [vmem:[#allocation8 + $0x28] sm:$0xff]  }
  0x29   :  { %387 = vmatprep.subr.bf16.mxu0 %v545_v0  ;;  %v444_v10 = vld [vmem:[#allocation8 + $0x38] sm:$0xff]   ;;  %v447_v13 = vld [vmem:[#allocation8 + $0x20] sm:$0xff]   ;;  %v449_v15 = vld [vmem:[#allocation8 + $0x10] sm:$0xff]  }
  0x2a   :  { %406 = vmatpush3.bf16.msra.mxu1 %v444_v10  ;;  %v448_v14 = vld [vmem:[#allocation8 + $0x18] sm:$0xff]   ;;  %v450_v16 = vld [vmem:[#allocation8 + $0x8] sm:$0xff]   ;;  %v451_v17 = vld [vmem:[#allocation8] sm:$0xff]  }
  0x2b   :  { %407 = vmatprep.subr.bf16.mxu1 %v545_v0  ;;  %v348_v19 = vld [vmem:[%s600_s2] ss:$0 sm:$0xff]  ;;  %s547_s2 = smov [#allocation9]  }
  0x2c   :  { %388 = vmatpush3.bf16.msra.mxu0 %v436_v2  ;;  %v366_v35 = vld [vmem:[%s602_s4] ss:$0 sm:$0xff]  ;;  %s335_s11 = sshll.u32 %s547_s2, 4  ;;  %s336_s11 = int_to_ptr.vmem [resolvable:$true] %s335_s11 }
  0x2d   :  { %389 = vmatprep.subr.bf16.mxu0 %v545_v0  ;;  %s514_s12 = scalar_lea.vmem %s336_s11, 256  ;;  %p519_p2 = scmp.lt.s32.totalorder %s336_s11, %s336_s11 }
  0x2e   :  { %408 = vmatpush3.bf16.msra.mxu1 %v445_v11  ;;  %p515_p1 = scmp.ne.s32.totalorder %s336_s11, %s514_s12  ;;  %p520_p3 = scmp.lt.s32.totalorder %s514_s12, %s514_s12 }
  0x2f   :  { %409 = vmatprep.subr.bf16.mxu1 %v545_v0 }
  0x30   :  { %390 = vmatpush3.bf16.msra.mxu0 %v437_v3  ;;  %p521_p4 = por %p520_p3, %p519_p2 }
  0x31   :  { %391 = vmatprep.subr.bf16.mxu0 %v545_v0 }
  0x32   :  { %410 = vmatpush3.bf16.msra.mxu1 %v446_v12  ;;  %p522_p5 = pnand %p521_p4, %p515_p1 }
  0x33   :  { %411 = vmatprep.subr.bf16.mxu1 %v545_v0 }
  0x34   :  { %392 = vmatpush3.bf16.msra.mxu0 %v438_v4 }
  0x35   :  { %393 = vmatprep.subr.bf16.mxu0 %v545_v0 }
  0x36   :  { %412 = vmatpush3.bf16.msra.mxu1 %v447_v13 }
  0x37   :  { %413 = vmatprep.subr.bf16.mxu1 %v545_v0 }
  0x38   :  { %394 = vmatpush3.bf16.msra.mxu0 %v439_v5 }
  0x39   :  { %395 = vmatprep.subr.bf16.mxu0 %v545_v0 }
  0x3a   :  { %414 = vmatpush3.bf16.msra.mxu1 %v448_v14 }
  0x3b   :  { %415 = vmatprep.subr.bf16.mxu1 %v545_v0 }
  0x3c   :  { %396 = vmatpush3.bf16.msra.mxu0 %v440_v6 }
  0x3d   :  { %397 = vmatprep.subr.bf16.mxu0 %v545_v0 }
  0x3e   :  { %416 = vmatpush3.bf16.msra.mxu1 %v449_v15 }
  0x3f   :  { %417 = vmatprep.subr.bf16.mxu1 %v545_v0 }
  0x40   :  { %398 = vmatpush3.bf16.msra.mxu0 %v441_v7 }
  0x41   :  { %399 = vmatprep.subr.bf16.mxu0 %v545_v0 }
  0x42   :  { %418 = vmatpush3.bf16.msra.mxu1 %v450_v16 }
  0x43   :  { %419 = vmatprep.subr.bf16.mxu1 %v545_v0 }
  0x44   :  { %400 = vmatpush3.bf16.msra.mxu0 %v442_v8 }
  0x46   :  { %420 = vmatpush3.bf16.msra.mxu1 %v451_v17 }
  0x47   :  { %402 = vmatmul.mubr.bf16.vlgmr.msra.gmra.mxu0 %v443_v9 }
 0x107   :  { %v186_v18 = vpop.f32.mrf.mxu0 }
 0x108   :  { %v187_v22 = vadd.f32 %v348_v19, %v186_v18 }
 0x109   :  { %v403_v20 = vpop.f32.mrf.mxu0 }
 0x10b   :  { %v189_v21 = vpop.f32.mrf.mxu0 }
 0x10c   :  { %v190_v23 = vadd.f32 %v348_v19, %v189_v21 }
 0x10d   :  { %v404_v24 = vpop.f32.mrf.mxu0 }
 0x10e   :  { %v193_v25 = vpack.c.bf16 %v190_v23, %v187_v22 }
 0x110   :  { %v195_v26 = vmul.bf16 %v193_v25, %v193_v25  ;;  %v194_v32 = vmul.bf16 1056980736, %v193_v25 }
 0x112   :  { %v196_v27 = vmul.bf16 %v195_v26, %v193_v25 }
 0x114   :  { %v197_v28 = vmul.bf16 1027030327, %v196_v27 }
 0x116   :  { %v198_v29 = vadd.bf16 %v197_v28, %v193_v25 }
 0x118   :  { %v199_v30 = vmul.bf16 1061961548, %v198_v29 }
 0x11a   :  { %452 = vtanh.bf16 %v199_v30 }
 0x128   :  { %v453_v31 = vpop.eup %452 }
 0x129   :  { %v201_v33 = vadd.bf16 1065369472, %v453_v31 }
 0x12b   :  { %v202_v34 = vmul.bf16 %v201_v33, %v194_v32 }
 0x12d   :  { %422 = vmatmul.mubr.bf16.vlgmr.msra.gmra.mxu1 %v202_v34 }
 0x1ed   :  { %v303_v36 = vpop.f32.mrf.mxu1 }
 0x1ee   :  { %v326_v37 = vadd.f32 %v366_v35, %v303_v36 }
 0x1ef   :  { %v423_v38 = vpop.f32.mrf.mxu1 }
 0x1f0   :  { %328 = vst [vmem:[#allocation9] sm:$0xff] %v326_v37 }
 0x1f1   :  { %v306_v39 = vpop.f32.mrf.mxu1 }
 0x1f2   :  { %v327_v40 = vadd.f32 %v366_v35, %v306_v39 }
 0x1f3   :  { %v424_v41 = vpop.f32.mrf.mxu1 }
 0x1f4   :  { %329 = vst [vmem:[#allocation9 + $0x8] sm:$0xff] %v327_v40 }
 0x1f5   :  { %525 = shalt.err (!%p522_p5)
}
 0x1f6   :  { %s548_s13 = smov 128   ;;  %s549_s4 = smov 8  }
 0x1f7   :  { %341 = dma.vmem_to_hbm [thread:$0]  %s336_s11, 256, %s603_s5, [#allocation5], %s548_s13, %s548_s13, %s549_s4  }
 0x1f8   :  { %538 = dma.done.wait [#allocation5], 256  }
 0x1f9   :  { %539 = vsyncadd [#allocation5], 4294967040 }
 0x1fa   :  { %345 = vsyncpa [#allocation4], 1 }
 0x1fb   :  { %346 = vsyncpa [#allocation7], 1 }
 0x1fc   :  { %347 = vsyncpa [#allocation5], 1 }

</bundles_post_ra>
